<compile_context>
chip_gen: v5e
topology: v5e:2x2
jax: 0.10.0
libtpu: 0.0.40
codegen_flags: <defaults>
</compile_context>

<pallas_src>
import functools

import jax
import jax.numpy as jnp
from jax import lax
from jax.experimental import pallas as pl
from jax.experimental.pallas import tpu as pltpu


def _round_up(x, m):
    return ((x + m - 1) // m) * m


def _conv_matmul_kernel(p_ref, w_ref, b_ref, o_ref, acc_ref, *, activation, precision):
    # p_ref : (1, TK, TM)   im2col patch tile for one image; M on the lane axis (pipelined).
    # w_ref : (Cout, TK)    conv-weight slab for this K tile (resident when nk == 1).
    # b_ref : (Cout, 1)     conv bias (f32).
    # o_ref : (1, Cout, TM) output tile; TM is a multiple of 128 -> unmasked full-width vst.
    # acc_ref: (Cout, TM)   f32 accumulator scratch, carried across the K grid axis.
    k = pl.program_id(2)

    @pl.when(k == 0)
    def _():
        acc_ref[...] = jnp.zeros_like(acc_ref)

    acc_ref[...] += jnp.dot(w_ref[...], p_ref[0],
                            preferred_element_type=jnp.float32,
                            precision=precision)

    @pl.when(k == pl.num_programs(2) - 1)
    def _():
        # NOTE: zero-padded M columns (beyond Ho*Wo) also receive bias+activation here; they
        # are sliced off in the wrapper, so any activation mapping 0 -> finite is safe.  Do
        # not rely on the contents of those columns.
        y = acc_ref[...] + b_ref[...]
        if activation is not None:
            y = activation(y)
        o_ref[0] = y.astype(o_ref.dtype)


def _im2col(x_nchw, kh, kw, stride, padding, k_pad, m_pad):
    """(N, Cin, H, W) -> (N, K_pad, M_pad) patches.
    K = Cin*KH*KW ordered to match weight.reshape(Cout, -1); M = Ho*Wo (Wo fastest).
    Zero padding of K/M is folded into this producer (fuses with the transpose under jit),
    so there is no separate pad round trip over HBM."""
    n, cin, h, w = x_nchw.shape
    sh, sw = stride
    ph, pw = padding
    xp = jnp.pad(x_nchw, ((0, 0), (0, 0), (ph, ph), (pw, pw)))  # nn.Conv2d zero padding
    ho = (h + 2 * ph - kh) // sh + 1
    wo = (w + 2 * pw - kw) // sw + 1
    taps = []
    for i in range(kh):
        for j in range(kw):
            taps.append(xp[:, :, i:i + (ho - 1) * sh + 1:sh, j:j + (wo - 1) * sw + 1:sw])
    taps = jnp.stack(taps, axis=0).reshape(kh, kw, n, cin, ho, wo)
    patches = jnp.transpose(taps, (2, 3, 0, 1, 4, 5)).reshape(n, cin * kh * kw, ho * wo)
    k_dim, hw = cin * kh * kw, ho * wo
    if k_pad != k_dim or m_pad != hw:
        patches = jnp.pad(patches, ((0, 0), (0, k_pad - k_dim), (0, m_pad - hw)))
    return patches


def conv2d_pallas(x_nchw, weight_oihw, bias, *, stride=(1, 1), padding=(0, 0),
                  activation=None, tile_m=512, matmul_dtype=jnp.bfloat16,
                  max_k_block=2048, vmem_budget_bytes=28 * 2**20):
    """Forward matching Conv2d(in_ch, out_ch, kernel_size, stride, padding, activation)."""
    n, cin, h, w = x_nchw.shape
    cout, cin_w, kh, kw = weight_oihw.shape
    assert cin == cin_w
    sh, sw = stride
    ph, pw = padding
    ho = (h + 2 * ph - kh) // sh + 1
    wo = (w + 2 * pw - kw) // sw + 1
    hw = ho * wo
    k_dim = cin * kh * kw

    in_dtype = matmul_dtype if matmul_dtype is not None else x_nchw.dtype
    in_bytes = jnp.dtype(in_dtype).itemsize
    out_bytes = jnp.dtype(x_nchw.dtype).itemsize

    # --- K tiling: bound the resident K slab (weight tile + patch tile) for large convs. ---
    if k_dim > max_k_block:
        tile_k = max_k_block                       # multiple of 128 (weight's lane axis)
        k_pad = _round_up(k_dim, tile_k)
    else:
        tile_k = k_dim                             # full extent -> no alignment constraint
        k_pad = k_dim
    nk = k_pad // tile_k

    # --- M tiling: lane-dense (multiple of 128), capped at the padded per-image size. ---
    tile_m = max(128, min(_round_up(tile_m, 128), _round_up(hw, 128)))

    # --- Fit the per-step working set inside a VMEM budget that is legal on v7x (64 MiB). ---
    def step_bytes(tm):
        return (2 * tile_k * tm * in_bytes         # double-buffered patch tile
                + 2 * cout * tm * out_bytes        # double-buffered output tile
                + cout * tm * 4                    # f32 accumulator scratch
                + 2 * cout * tile_k * in_bytes     # weight slab (worst case double-buffered)
                + 2 * cout * 4)                    # bias
    while tile_m > 128 and step_bytes(tile_m) > vmem_budget_bytes:
        tile_m -= 128

    m_pad = _round_up(hw, tile_m)
    nm = m_pad // tile_m

    patches = _im2col(x_nchw, kh, kw, stride, padding, k_pad, m_pad)
    w2 = weight_oihw.reshape(cout, k_dim)
    if k_pad != k_dim:
        w2 = jnp.pad(w2, ((0, 0), (0, k_pad - k_dim)))
    b2 = bias.astype(jnp.float32).reshape(cout, 1)

    precision = None
    if matmul_dtype is not None:   # bf16 MXU operands: ~2-3x MXU throughput, half DMA bytes
        patches = patches.astype(matmul_dtype)
        w2 = w2.astype(matmul_dtype)
    else:
        precision = lax.Precision.HIGHEST  # exact f32 parity with the PyTorch forward

    kernel = functools.partial(_conv_matmul_kernel, activation=activation, precision=precision)
    vmem_limit = int(min(max(2 * step_bytes(tile_m), 32 * 2**20), 48 * 2**20))

    # TODO(synk): for very large inputs do the im2col inside the kernel (input left at
    # memory_space=pl.ANY, manual halo-row make_async_copy into VMEM scratch, taps via strided
    # reads) to avoid the KH*KW HBM expansion of the patch matrix; at these shapes the matmul
    # form wins.  Weight/bias blocks are grid-invariant when nk == 1; single-buffering them
    # (pipeline_mode=pl.Buffered(1)) would reclaim a little VMEM for very large weights.
    out = pl.pallas_call(
        kernel,
        out_shape=jax.ShapeDtypeStruct((n, cout, m_pad), x_nchw.dtype),
        grid=(n, nm, nk),
        in_specs=[
            pl.BlockSpec((1, tile_k, tile_m), lambda b, i, k: (b, k, i)),  # pipelined patches
            pl.BlockSpec((cout, tile_k), lambda b, i, k: (0, k)),          # weight slab
            pl.BlockSpec((cout, 1), lambda b, i, k: (0, 0)),               # bias
        ],
        out_specs=pl.BlockSpec((1, cout, tile_m), lambda b, i, k: (b, 0, i)),
        scratch_shapes=[pltpu.VMEM((cout, tile_m), jnp.float32)],
        compiler_params=pltpu.CompilerParams(
            dimension_semantics=("parallel", "parallel", "arbitrary"),
            vmem_limit_bytes=vmem_limit,
        ),
    )(patches, w2, b2)

    # (N, Cout, Ho*Wo) is already NCHW-ordered: only the padded spatial tail has to be sliced.
    return out[:, :, :hw].reshape(n, cout, ho, wo)


def _reference(x_nchw, weight_oihw, bias, *, stride=(1, 1), padding=(0, 0), activation=None):
    """Pure-JAX reference mirroring the PyTorch forward (for the sanity check)."""
    y = lax.conv_general_dilated(
        x_nchw, weight_oihw, window_strides=stride,
        padding=[(padding[0], padding[0]), (padding[1], padding[1])],
        dimension_numbers=("NCHW", "OIHW", "NCHW"),
        precision=lax.Precision.HIGHEST,
    ) + bias[None, :, None, None]
    if activation is not None:
        y = activation(y)
    return y


if __name__ == "__main__":
    key = jax.random.PRNGKey(0)
    k_x, k_w, k_b = jax.random.split(key, 3)

    # Conv2d(in_channels=4, out_channels=8, kernel_size=(2, 2), stride=(1, 1), padding=(0, 0),
    #        activation='LeakyReLU') on a (2, 4, 16, 16) input.
    N, Cin, H, W = 2, 4, 16, 16
    Cout, KH, KW = 8, 2, 2
    stride, padding = (1, 1), (0, 0)

    x = jax.random.normal(k_x, (N, Cin, H, W), jnp.float32)
    weight = 0.1 * jax.random.normal(k_w, (Cout, Cin, KH, KW), jnp.float32)
    bias = 0.1 * jax.random.normal(k_b, (Cout,), jnp.float32)

    act = lambda v: jnp.where(v >= 0, v, 0.2 * v)  # LeakyReLU(negative_slope=0.2)

    conv_bf16 = jax.jit(functools.partial(
        conv2d_pallas, stride=stride, padding=padding, activation=act))          # bf16 default
    conv_f32 = jax.jit(functools.partial(
        conv2d_pallas, stride=stride, padding=padding, activation=act, matmul_dtype=None))

    ref = jax.block_until_ready(
        _reference(x, weight, bias, stride=stride, padding=padding, activation=act))

    Ho = (H + 2 * padding[0] - KH) // stride[0] + 1
    Wo = (W + 2 * padding[1] - KW) // stride[1] + 1

    # Default (bf16 MXU operands, f32 accumulation/epilogue).
    out = jax.block_until_ready(conv_bf16(x, weight, bias))
    assert out.shape == (N, Cout, Ho, Wo) and out.dtype == jnp.float32
    assert jnp.allclose(out, ref, rtol=2e-2, atol=2e-2), float(jnp.max(jnp.abs(out - ref)))

    # Exact-parity path (f32 operands, HIGHEST precision matmul).
    out32 = jax.block_until_ready(conv_f32(x, weight, bias))
    assert out32.shape == (N, Cout, Ho, Wo) and out32.dtype == jnp.float32
    assert jnp.allclose(out32, ref, rtol=1e-3, atol=1e-3), float(jnp.max(jnp.abs(out32 - ref)))

    print("KERNEL_OK")
</pallas_src>

<mosaic_0001>
module attributes {stable_mosaic.version = 11 : i64} {
  func.func @_conv_matmul_kernel(%arg0: i32, %arg1: i32, %arg2: i32, %arg3: memref<1x16x256xbf16, #tpu.memory_space<vmem>>, %arg4: memref<8x16xbf16, #tpu.memory_space<vmem>>, %arg5: memref<8x1xf32, #tpu.memory_space<vmem>>, %arg6: memref<1x8x256xf32, #tpu.memory_space<vmem>>, %arg7: memref<8x256xf32, #tpu.memory_space<vmem>>) attributes {dimension_semantics = [#tpu.dimension_semantics<parallel>, #tpu.dimension_semantics<parallel>, #tpu.dimension_semantics<arbitrary>], iteration_bounds = array<i64: 2, 1, 1>, scalar_prefetch = 0 : i64, scratch_operands = 1 : i64, tpu.core_type = #tpu.core_type<tc>, window_params = [{transform_indices = @transform_0, window_bounds = array<i64: 1, 16, 256>}, {transform_indices = @transform_1, window_bounds = array<i64: 8, 16>}, {pipeline_mode = #tpu.pipeline_mode<synchronous>, transform_indices = @transform_2, window_bounds = array<i64: 8, 1>}, {transform_indices = @transform_3, window_bounds = array<i64: 1, 8, 256>}]} {
    %c0_i32 = arith.constant 0 : i32
    %0 = arith.cmpi eq, %arg2, %c0_i32 : i32
    %1 = arith.extui %0 : i1 to i32
    %c0_i32_0 = arith.constant 0 : i32
    %2 = arith.cmpi ne, %1, %c0_i32_0 : i32
    scf.if %2 {
      %cst_11 = arith.constant 0.000000e+00 : f32
      %13 = vector.broadcast %cst_11 : f32 to vector<8x256xf32>
      %c0_12 = arith.constant 0 : index
      %c0_13 = arith.constant 0 : index
      %14 = vector.load %arg7[%c0_12, %c0_13] : memref<8x256xf32, #tpu.memory_space<vmem>>, vector<8x256xf32>
      tpu.vector_store %arg7[%c0_12, %c0_13], %13 {strides = array<i32>} : memref<8x256xf32, #tpu.memory_space<vmem>>, vector<8x256xf32>,
    } else {
    }
    %c0 = arith.constant 0 : index
    %c0_1 = arith.constant 0 : index
    %3 = vector.load %arg7[%c0, %c0_1] : memref<8x256xf32, #tpu.memory_space<vmem>>, vector<8x256xf32>
    %c0_2 = arith.constant 0 : index
    %c0_3 = arith.constant 0 : index
    %4 = vector.load %arg4[%c0_2, %c0_3] : memref<8x16xbf16, #tpu.memory_space<vmem>>, vector<8x16xbf16>
    %c0_4 = arith.constant 0 : index
    %c0_5 = arith.constant 0 : index
    %c0_6 = arith.constant 0 : index
    %5 = vector.load %arg3[%c0_4, %c0_5, %c0_6] : memref<1x16x256xbf16, #tpu.memory_space<vmem>>, vector<1x16x256xbf16>
    %6 = vector.shape_cast %5 : vector<1x16x256xbf16> to vector<16x256xbf16>
    %cst = arith.constant dense<0.000000e+00> : vector<8x256xf32>
    %7 = tpu.matmul %4, %6, %cst {dimension_numbers = #tpu.dot_dimension_numbers<[1], [0], [0], [1], [0, 0, 1, 1], [], []>} : vector<8x16xbf16>, vector<16x256xbf16>, vector<8x256xf32> -> vector<8x256xf32>
    %8 = arith.addf %3, %7 : vector<8x256xf32>
    %c0_7 = arith.constant 0 : index
    %c0_8 = arith.constant 0 : index
    %9 = vector.load %arg7[%c0_7, %c0_8] : memref<8x256xf32, #tpu.memory_space<vmem>>, vector<8x256xf32>
    tpu.vector_store %arg7[%c0_7, %c0_8], %8 {strides = array<i32>} : memref<8x256xf32, #tpu.memory_space<vmem>>, vector<8x256xf32>,
    %c0_i32_9 = arith.constant 0 : i32
    %10 = arith.cmpi eq, %arg2, %c0_i32_9 : i32
    %11 = arith.extui %10 : i1 to i32
    %c0_i32_10 = arith.constant 0 : i32
    %12 = arith.cmpi ne, %11, %c0_i32_10 : i32
    scf.if %12 {
      %c0_11 = arith.constant 0 : index
      %c0_12 = arith.constant 0 : index
      %13 = vector.load %arg7[%c0_11, %c0_12] : memref<8x256xf32, #tpu.memory_space<vmem>>, vector<8x256xf32>
      %c0_13 = arith.constant 0 : index
      %c0_14 = arith.constant 0 : index
      %14 = vector.load %arg5[%c0_13, %c0_14] : memref<8x1xf32, #tpu.memory_space<vmem>>, vector<8x1xf32>
      %15 = vector.broadcast %14 : vector<8x1xf32> to vector<8x256xf32>
      %16 = arith.addf %13, %15 : vector<8x256xf32>
      %cst_15 = arith.constant 0.000000e+00 : f32
      %17 = vector.broadcast %cst_15 : f32 to vector<8x256xf32>
      %18 = arith.cmpf oge, %16, %17 : vector<8x256xf32>
      %cst_16 = arith.constant 2.000000e-01 : f32
      %19 = vector.broadcast %cst_16 : f32 to vector<8x256xf32>
      %20 = arith.mulf %19, %16 : vector<8x256xf32>
      %21 = arith.select %18, %16, %20 : vector<8x256xi1>, vector<8x256xf32>
      %c0_17 = arith.constant 0 : index
      %c0_18 = arith.constant 0 : index
      %c0_19 = arith.constant 0 : index
      %22 = vector.load %arg6[%c0_17, %c0_18, %c0_19] : memref<1x8x256xf32, #tpu.memory_space<vmem>>, vector<1x8x256xf32>
      %23 = vector.shape_cast %22 : vector<1x8x256xf32> to vector<8x256xf32>
      %24 = vector.shape_cast %21 : vector<8x256xf32> to vector<1x8x256xf32>
      tpu.vector_store %arg6[%c0_17, %c0_18, %c0_19], %24 {strides = array<i32>} : memref<1x8x256xf32, #tpu.memory_space<vmem>>, vector<1x8x256xf32>,
    } else {
    }
    return
  }
  func.func @transform_0(%arg0: i32, %arg1: i32, %arg2: i32) -> (i32, i32, i32) {
    %c0_i32 = arith.constant 0 : i32
    return %arg0, %arg2, %arg1 : i32, i32, i32
  }
  func.func @transform_1(%arg0: i32, %arg1: i32, %arg2: i32) -> (i32, i32) {
    %c0_i32 = arith.constant 0 : i32
    %c0_i32_0 = arith.constant 0 : i32
    return %c0_i32, %arg2 : i32, i32
  }
  func.func @transform_2(%arg0: i32, %arg1: i32, %arg2: i32) -> (i32, i32) {
    %c0_i32 = arith.constant 0 : i32
    %c0_i32_0 = arith.constant 0 : i32
    %c0_i32_1 = arith.constant 0 : i32
    return %c0_i32, %c0_i32_0 : i32, i32
  }
  func.func @transform_3(%arg0: i32, %arg1: i32, %arg2: i32) -> (i32, i32, i32) {
    %c0_i32 = arith.constant 0 : i32
    %c0_i32_0 = arith.constant 0 : i32
    return %arg0, %c0_i32, %arg1 : i32, i32, i32
  }
}

</mosaic_0001>

<bundles_post_ra>
// kernel: conv2d_pallas.1
= control target key start
LH: loop header
LB: loop body
LE: loop exit
PB: predicated region body
PF: predicated region fallthrough
CT: control target
= control target key end

     0   :  { %s538_s12 = smov 0   ;;  %s540_s13 = smov 0   ;;  %s577_s0 = inlined_call_operand.vmem [shape: bf16[2,16,256], index: 0, kind: input, shape index: {}]   ;;  %s578_s1 = inlined_call_operand.vmem [shape: bf16[8,16], index: 1, kind: input, shape index: {}]   ;;  %s579_s2 = inlined_call_operand.vmem [shape: f32[8,1], index: 2, kind: input, shape index: {}]   ;;  %s580_s3 = inlined_call_operand.vmem [shape: f32[2,8,256], index: 3, kind: output, shape index: {}]  }
   0x1   :  { %s542_s14 = smov 0  }
   0x2 LB: > { %s32_s15 = sadd.s32 1, %s511_s13  ;;  %p446_p0 = scmp.ge.s32.totalorder %s515_s14, 1  ;;  %s515_s14 = sphi %s542_s14, %s13_s14   ;;  %s511_s13 = sphi %s540_s13, %s582_s13   ;;  %s507_s12 = sphi %s538_s12, %s581_s12  }
   0x3   : > { %p34_p1 = scmp.ge.s32.totalorder %s32_s15, 2  ;;  %p182_p2 = scmp.lt.s32.totalorder %s515_s14, 3 }
   0x5   : > { %s584_s15 = smov (%p34_p1, %s32_s15), 0  ;;  %p183_p3 = pnand %p446_p0, %p182_p2 }
   0x6   : > { %p225_p4 = scmp.lt.s32.totalorder (!%p183_p3), %s507_s12, 1 }
   0x7   : > { %186 = sbr.rel (%p183_p3) target bundleno = 156 (0x9c), region = 32 }
   0xc   : > { %v314_v0 = vld [vmem:[%s579_s2] sm:$0xff]  ;;  %v517_v1 = vmov 0   ;;  %s586_s12 = smov (!%p225_p4, %s507_s12), 1  ;;  %vm275_vm0 = vcmask 130048  }
   0xd   : > { %492 = vset.pattern.permute.xlu0 %v517_v1  ;;  %s463_s18 = sshll.u32 %s586_s12, 4  ;;  %v262_v8 = vld [vmem:[%s578_s1] sm:$0xf] }
   0xe   : > { %317 = vperm.xlu0 %492, %v314_v0   ;;  %s236_s21 = scalar_lea.vmem %s577_s0, %s463_s18  ;;  %s251_s26 = scalar_lea.vmem %s580_s3, %s463_s18 }
   0xf   : > { %v453_v2 = vld [vmem:[%s236_s21] sm:$0xf]  ;;  %v466_v3 = vld [vmem:[%s236_s21 + $0x4] sm:$0xf0]  ;;  %v465_v4 = vld [vmem:[%s236_s21 + $0x4] sm:$0xf] }
  0x10   : > { %v454_v5 = vor.u32 %v466_v3, %v453_v2  ;;  %v455_v6 = vld [vmem:[%s236_s21 + $0x8] sm:$0xf0] }
  0x11   : > { %v458_v7 = vor.u32 %v465_v4, %v455_v6 }
  0x12   : > { %286 = vmatpush.bf16.msra.mxu0 %v454_v5 }
  0x13   : > { %299 = vmatpush.bf16.msra.mxu1 %v458_v7 }
  0x15   : > { %459 = vmatmul.msk.bf16.vlgmr.msra.gmra.mxu0 %vm275_vm0, %v262_v8 }
  0x16   : > { %460 = vmatmul.msk.bf16.vlgmr.msra.gmra.mxu1 %vm275_vm0, %v262_v8 }
  0x80   : > { %v318_v9 = vpop.permute.xlu0 %317 }
  0x92   : > { %v288_v10 = vpop.f32.mrf.mxu0 }
  0x93   : > { %v320_v11 = vadd.f32 %v318_v9, %v288_v10  ;;  %v301_v12 = vpop.f32.mrf.mxu1 }
  0x94   : > { %v321_v13 = vadd.f32 %v318_v9, %v301_v12 }
  0x95   : > { %vm322_vm1 = vcmp.ge.f32.partialorder %v320_v11, 0.0  ;;  %v324_v14 = vmul.f32 0.2, %v320_v11 }
  0x96   : > { %vm323_vm2 = vcmp.ge.f32.partialorder %v321_v13, 0.0  ;;  %v325_v15 = vmul.f32 0.2, %v321_v13 }
  0x97   : > { %v326_v16 = vsel %vm322_vm1, %v320_v11, %v324_v14 }
  0x98   : > { %328 = vst [vmem:[%s251_s26] sm:$0xff] %v326_v16  ;;  %v327_v17 = vsel %vm323_vm2, %v321_v13, %v325_v15 }
  0x99   : > { %329 = vst [vmem:[%s251_s26 + $0x8] sm:$0xff] %v327_v17 }
  0x9a   : > { %v290_v18 = vpop.f32.mrf.mxu0 }
  0x9b   : > { %v303_v19 = vpop.f32.mrf.mxu1 }
  0x9c PF: > { %s13_s14 = sadd.s32 1, %s515_s14   ;;  %s581_s12 = smov %s511_s13 }
  0x9d   : > { %p10_p5 = scmp.ge.s32.totalorder %s13_s14, 4   ;;  %s582_s13 = smov %s584_s15 }
  0x9f   :  { %12 = sbr.rel (!%p10_p5) target bundleno = 2 (0x2), region = 73 }

</bundles_post_ra>
